<compile_context>
chip_gen: v5e
topology: v5e:2x2
jax: 0.10.0
libtpu: 0.0.40
codegen_flags: <defaults>
</compile_context>

<pallas_src>
import jax
import jax.numpy as jnp
from jax.experimental import pallas as pl
from jax.experimental.pallas import tpu as pltpu

LN_EPS = 1e-5   # torch.nn.LayerNorm default
BN_EPS = 1e-5   # torch.nn.BatchNorm1d default


def _conv_module_kernel(x_ref, w1_ref, b1_ref, wdw_ref, bdw_ref, w2_ref, o_ref):
    # x_ref:   (1, T, D)   input rows for one batch element
    # w1_ref:  (D, 2C)     1x1 conv #1 weights (LN gamma folded in)
    # b1_ref:  (1, 2C)     folded LN beta contribution
    # wdw_ref: (K, 1, C)   depthwise weights (BN scale folded in)
    # bdw_ref: (1, C)      folded BN shift
    # w2_ref:  (C, D)      1x1 conv #2 weights
    T = x_ref.shape[1]
    K = wdw_ref.shape[0]
    C = wdw_ref.shape[2]
    P = (K - 1) // 2

    x = x_ref[0].astype(jnp.float32)                       # (T, D)

    # --- LayerNorm statistics (affine folded into w1/b1), single-pass var ---
    mean = jnp.mean(x, axis=-1, keepdims=True)
    var = jnp.mean(x * x, axis=-1, keepdims=True) - mean * mean
    xn = (x - mean) * jax.lax.rsqrt(var + LN_EPS)          # (T, D)

    # --- 1x1 conv (D -> 2C) as MXU matmul, f32 accumulation; then GLU ---
    h = jnp.dot(xn.astype(w1_ref.dtype), w1_ref[...],
                preferred_element_type=jnp.float32)
    h = h + b1_ref[...].astype(jnp.float32)                # (T, 2C)
    g = h[:, :C] * jax.nn.sigmoid(h[:, C:])                # GLU -> (T, C)

    # --- depthwise conv along T, SAME zero padding (BN folded in) ---
    pad = jnp.zeros((P, C), jnp.float32)
    gp = jnp.concatenate([pad, g, pad], axis=0)            # (T + K - 1, C)
    wdw = wdw_ref[...].astype(jnp.float32)                 # (K, 1, C)
    acc = jnp.zeros((T, C), jnp.float32)
    for k in range(K):                                     # K is small; unrolled
        acc = acc + gp[k:k + T, :] * wdw[k]                # wdw[k]: (1, C)
    acc = acc + bdw_ref[...].astype(jnp.float32)           # BN shift

    # --- SiLU + 1x1 conv (C -> D) ---
    s = acc * jax.nn.sigmoid(acc)
    y = jnp.dot(s.astype(w2_ref.dtype), w2_ref[...],
                preferred_element_type=jnp.float32)        # (T, D)

    # Dropout(p=0.0) is the identity -> nothing to do.
    o_ref[0] = y.astype(o_ref.dtype)


def conv_module(x, ln_gamma, ln_beta, w_pw1, w_dw,
                bn_gamma, bn_beta, bn_mean, bn_var, w_pw2):
    """Forward of _ConvolutionModule (bias=False convs, dropout=0, eval-mode BN).

    x:      (B, T, D)
    w_pw1:  (2C, D, 1)   torch Conv1d weight layout
    w_dw:   (C, 1, K)    depthwise Conv1d weight
    w_pw2:  (D, C, 1)
    """
    B, T, D = x.shape
    C = w_pw1.shape[0] // 2
    K = w_dw.shape[2]

    # Fold LayerNorm affine into the first 1x1 conv.
    w1_mat = jnp.transpose(w_pw1[:, :, 0])                       # (D, 2C)
    w1f = ln_gamma[:, None].astype(w1_mat.dtype) * w1_mat        # (D, 2C)
    b1f = (ln_beta @ w1_mat)[None, :]                            # (1, 2C)

    # Fold eval-mode BatchNorm into the depthwise conv.
    bn_scale = bn_gamma * jax.lax.rsqrt(bn_var + BN_EPS)         # (C,)
    bn_shift = bn_beta - bn_mean * bn_scale                      # (C,)
    wdwf = jnp.transpose(w_dw[:, 0, :] * bn_scale[:, None])      # (K, C)
    wdwf = wdwf[:, None, :]                                      # (K, 1, C)
    bdw = bn_shift[None, :]                                      # (1, C)

    w2_mat = jnp.transpose(w_pw2[:, :, 0])                       # (C, D)

    out = pl.pallas_call(
        _conv_module_kernel,
        out_shape=jax.ShapeDtypeStruct((B, T, D), x.dtype),
        grid_spec=pltpu.PrefetchScalarGridSpec(
            num_scalar_prefetch=0,
            grid=(B,),
            in_specs=[
                pl.BlockSpec((1, T, D), lambda b: (b, 0, 0)),    # x rows
                pl.BlockSpec((D, 2 * C), lambda b: (0, 0)),      # w1 (folded)
                pl.BlockSpec((1, 2 * C), lambda b: (0, 0)),      # b1 (folded)
                pl.BlockSpec((K, 1, C), lambda b: (0, 0, 0)),    # depthwise w
                pl.BlockSpec((1, C), lambda b: (0, 0)),          # BN shift
                pl.BlockSpec((C, D), lambda b: (0, 0)),          # w2
            ],
            out_specs=pl.BlockSpec((1, T, D), lambda b: (b, 0, 0)),
        ),
        compiler_params=pltpu.CompilerParams(
            dimension_semantics=("parallel",)),
    )(x, w1f, b1f, wdwf, bdw, w2_mat)
    return out


def _reference(x, ln_gamma, ln_beta, w_pw1, w_dw,
               bn_gamma, bn_beta, bn_mean, bn_var, w_pw2):
    """Pure-JAX reference matching the PyTorch module (eval mode)."""
    B, T, D = x.shape
    C = w_pw1.shape[0] // 2
    K = w_dw.shape[2]
    P = (K - 1) // 2

    xf = x.astype(jnp.float32)
    mean = jnp.mean(xf, axis=-1, keepdims=True)
    var = jnp.mean((xf - mean) ** 2, axis=-1, keepdims=True)
    xn = (xf - mean) / jnp.sqrt(var + LN_EPS) * ln_gamma + ln_beta   # (B,T,D)

    h = jnp.einsum('btd,cd->btc', xn, w_pw1[:, :, 0])                # (B,T,2C)
    g = h[..., :C] * jax.nn.sigmoid(h[..., C:])                      # GLU

    gp = jnp.pad(g, ((0, 0), (P, P), (0, 0)))
    dw = jnp.zeros_like(g)
    for k in range(K):
        dw = dw + gp[:, k:k + T, :] * w_dw[:, 0, k][None, None, :]

    scale = bn_gamma / jnp.sqrt(bn_var + BN_EPS)
    dw = (dw - bn_mean) * scale + bn_beta
    dw = dw * jax.nn.sigmoid(dw)                                     # SiLU

    y = jnp.einsum('btc,dc->btd', dw, w_pw2[:, :, 0])
    return y.astype(x.dtype)


if __name__ == "__main__":
    # Small shapes consistent with the module: (B, T, D), C channels, kernel K.
    B, T, D, C, K = 2, 16, 32, 32, 5

    key = jax.random.PRNGKey(0)
    ks = jax.random.split(key, 10)

    x = jax.random.normal(ks[0], (B, T, D), jnp.float32)

    # LayerNorm parameters.
    ln_gamma = 1.0 + 0.1 * jax.random.normal(ks[1], (D,), jnp.float32)
    ln_beta = 0.1 * jax.random.normal(ks[2], (D,), jnp.float32)

    # Conv weights in torch layout (bias=False, matching the module default).
    w_pw1 = jax.random.normal(ks[3], (2 * C, D, 1), jnp.float32) / jnp.sqrt(D)
    w_dw = jax.random.normal(ks[4], (C, 1, K), jnp.float32) / jnp.sqrt(K)
    w_pw2 = jax.random.normal(ks[5], (D, C, 1), jnp.float32) / jnp.sqrt(C)

    # BatchNorm1d (eval mode) parameters / running stats.
    bn_gamma = 1.0 + 0.1 * jax.random.normal(ks[6], (C,), jnp.float32)
    bn_beta = 0.1 * jax.random.normal(ks[7], (C,), jnp.float32)
    bn_mean = 0.05 * jax.random.normal(ks[8], (C,), jnp.float32)
    bn_var = 1.0 + 0.1 * jnp.abs(jax.random.normal(ks[9], (C,), jnp.float32))

    out = conv_module(x, ln_gamma, ln_beta, w_pw1, w_dw,
                      bn_gamma, bn_beta, bn_mean, bn_var, w_pw2)
    out = jax.block_until_ready(out)

    ref = _reference(x, ln_gamma, ln_beta, w_pw1, w_dw,
                     bn_gamma, bn_beta, bn_mean, bn_var, w_pw2)

    assert out.shape == x.shape and out.dtype == x.dtype
    assert jnp.allclose(out, ref, atol=1e-3, rtol=1e-3), "mismatch vs reference"

    print("KERNEL_OK")
</pallas_src>

<mosaic_0001>
module attributes {stable_mosaic.version = 11 : i64} {
  func.func @_conv_module_kernel(%arg0: i32, %arg1: memref<1x16x32xf32, #tpu.memory_space<vmem>>, %arg2: memref<32x64xf32, #tpu.memory_space<vmem>>, %arg3: memref<1x64xf32, #tpu.memory_space<vmem>>, %arg4: memref<5x1x32xf32, #tpu.memory_space<vmem>>, %arg5: memref<1x32xf32, #tpu.memory_space<vmem>>, %arg6: memref<32x32xf32, #tpu.memory_space<vmem>>, %arg7: memref<1x16x32xf32, #tpu.memory_space<vmem>>) attributes {dimension_semantics = [#tpu.dimension_semantics<parallel>], iteration_bounds = array<i64: 2>, scalar_prefetch = 0 : i64, scratch_operands = 0 : i64, tpu.core_type = #tpu.core_type<tc>, window_params = [{transform_indices = @transform_0, window_bounds = array<i64: 1, 16, 32>}, {pipeline_mode = #tpu.pipeline_mode<synchronous>, transform_indices = @transform_1, window_bounds = array<i64: 32, 64>}, {pipeline_mode = #tpu.pipeline_mode<synchronous>, transform_indices = @transform_2, window_bounds = array<i64: 1, 64>}, {pipeline_mode = #tpu.pipeline_mode<synchronous>, transform_indices = @transform_3, window_bounds = array<i64: 5, 1, 32>}, {pipeline_mode = #tpu.pipeline_mode<synchronous>, transform_indices = @transform_4, window_bounds = array<i64: 1, 32>}, {pipeline_mode = #tpu.pipeline_mode<synchronous>, transform_indices = @transform_5, window_bounds = array<i64: 32, 32>}, {transform_indices = @transform_6, window_bounds = array<i64: 1, 16, 32>}]} {
    %c0 = arith.constant 0 : index
    %c0_0 = arith.constant 0 : index
    %c0_1 = arith.constant 0 : index
    %0 = vector.load %arg1[%c0, %c0_0, %c0_1] : memref<1x16x32xf32, #tpu.memory_space<vmem>>, vector<1x16x32xf32>
    %1 = vector.shape_cast %0 : vector<1x16x32xf32> to vector<16x32xf32>
    %cst = arith.constant dense<0.000000e+00> : vector<16xf32>
    %2 = vector.multi_reduction <add>, %1, %cst [1] : vector<16x32xf32> to vector<16xf32>
    %3 = vector.shape_cast %2 : vector<16xf32> to vector<16x1xf32>
    %cst_2 = arith.constant 3.200000e+01 : f32
    %4 = vector.broadcast %cst_2 : f32 to vector<16x1xf32>
    %5 = arith.divf %3, %4 : vector<16x1xf32>
    %6 = arith.mulf %1, %1 : vector<16x32xf32>
    %cst_3 = arith.constant dense<0.000000e+00> : vector<16xf32>
    %7 = vector.multi_reduction <add>, %6, %cst_3 [1] : vector<16x32xf32> to vector<16xf32>
    %8 = vector.shape_cast %7 : vector<16xf32> to vector<16x1xf32>
    %cst_4 = arith.constant 3.200000e+01 : f32
    %9 = vector.broadcast %cst_4 : f32 to vector<16x1xf32>
    %10 = arith.divf %8, %9 : vector<16x1xf32>
    %11 = arith.mulf %5, %5 : vector<16x1xf32>
    %12 = arith.subf %10, %11 : vector<16x1xf32>
    %13 = vector.broadcast %5 : vector<16x1xf32> to vector<16x32xf32>
    %14 = arith.subf %1, %13 : vector<16x32xf32>
    %cst_5 = arith.constant 9.99999974E-6 : f32
    %15 = vector.broadcast %cst_5 : f32 to vector<16x1xf32>
    %16 = arith.addf %12, %15 : vector<16x1xf32>
    %17 = math.rsqrt %16 : vector<16x1xf32>
    %18 = vector.broadcast %17 : vector<16x1xf32> to vector<16x32xf32>
    %19 = arith.mulf %14, %18 : vector<16x32xf32>
    %c0_6 = arith.constant 0 : index
    %c0_7 = arith.constant 0 : index
    %20 = vector.load %arg2[%c0_6, %c0_7] : memref<32x64xf32, #tpu.memory_space<vmem>>, vector<32x64xf32>
    %cst_8 = arith.constant dense<0.000000e+00> : vector<16x64xf32>
    %21 = tpu.matmul %19, %20, %cst_8 {dimension_numbers = #tpu.dot_dimension_numbers<[1], [0], [0], [1], [0, 0, 1, 1], [], []>} : vector<16x32xf32>, vector<32x64xf32>, vector<16x64xf32> -> vector<16x64xf32>
    %c0_9 = arith.constant 0 : index
    %c0_10 = arith.constant 0 : index
    %22 = vector.load %arg3[%c0_9, %c0_10] : memref<1x64xf32, #tpu.memory_space<vmem>>, vector<1x64xf32>
    %23 = vector.broadcast %22 : vector<1x64xf32> to vector<16x64xf32>
    %24 = arith.addf %21, %23 : vector<16x64xf32>
    %25 = vector.extract_strided_slice %24 {offsets = [0, 0], sizes = [16, 32], strides = [1, 1]} : vector<16x64xf32> to vector<16x32xf32>
    %26 = vector.extract_strided_slice %24 {offsets = [0, 32], sizes = [16, 32], strides = [1, 1]} : vector<16x64xf32> to vector<16x32xf32>
    %27 = arith.negf %26 : vector<16x32xf32>
    %28 = math.exp %27 : vector<16x32xf32>
    %cst_11 = arith.constant 1.000000e+00 : f32
    %29 = vector.broadcast %cst_11 : f32 to vector<16x32xf32>
    %30 = arith.addf %29, %28 : vector<16x32xf32>
    %31 = arith.divf %29, %30 : vector<16x32xf32>
    %32 = arith.mulf %25, %31 : vector<16x32xf32>
    %cst_12 = arith.constant 0.000000e+00 : f32
    %33 = vector.broadcast %cst_12 : f32 to vector<2x32xf32>
    %34 = tpu.concatenate %33, %32, %33 in 0 : vector<2x32xf32>, vector<16x32xf32>, vector<2x32xf32> -> vector<20x32xf32>
    %c0_13 = arith.constant 0 : index
    %c0_14 = arith.constant 0 : index
    %c0_15 = arith.constant 0 : index
    %35 = vector.load %arg4[%c0_13, %c0_14, %c0_15] : memref<5x1x32xf32, #tpu.memory_space<vmem>>, vector<5x1x32xf32>
    %cst_16 = arith.constant 0.000000e+00 : f32
    %36 = vector.broadcast %cst_16 : f32 to vector<16x32xf32>
    %37 = vector.extract_strided_slice %34 {offsets = [0, 0], sizes = [16, 32], strides = [1, 1]} : vector<20x32xf32> to vector<16x32xf32>
    %38 = vector.extract_strided_slice %35 {offsets = [0, 0, 0], sizes = [1, 1, 32], strides = [1, 1, 1]} : vector<5x1x32xf32> to vector<1x1x32xf32>
    %39 = vector.shape_cast %38 : vector<1x1x32xf32> to vector<1x32xf32>
    %40 = vector.broadcast %39 : vector<1x32xf32> to vector<16x32xf32>
    %41 = arith.mulf %37, %40 : vector<16x32xf32>
    %42 = arith.addf %36, %41 : vector<16x32xf32>
    %43 = vector.extract_strided_slice %34 {offsets = [1, 0], sizes = [16, 32], strides = [1, 1]} : vector<20x32xf32> to vector<16x32xf32>
    %44 = vector.extract_strided_slice %35 {offsets = [1, 0, 0], sizes = [1, 1, 32], strides = [1, 1, 1]} : vector<5x1x32xf32> to vector<1x1x32xf32>
    %45 = vector.shape_cast %44 : vector<1x1x32xf32> to vector<1x32xf32>
    %46 = vector.broadcast %45 : vector<1x32xf32> to vector<16x32xf32>
    %47 = arith.mulf %43, %46 : vector<16x32xf32>
    %48 = arith.addf %42, %47 : vector<16x32xf32>
    %49 = vector.extract_strided_slice %34 {offsets = [2, 0], sizes = [16, 32], strides = [1, 1]} : vector<20x32xf32> to vector<16x32xf32>
    %50 = vector.extract_strided_slice %35 {offsets = [2, 0, 0], sizes = [1, 1, 32], strides = [1, 1, 1]} : vector<5x1x32xf32> to vector<1x1x32xf32>
    %51 = vector.shape_cast %50 : vector<1x1x32xf32> to vector<1x32xf32>
    %52 = vector.broadcast %51 : vector<1x32xf32> to vector<16x32xf32>
    %53 = arith.mulf %49, %52 : vector<16x32xf32>
    %54 = arith.addf %48, %53 : vector<16x32xf32>
    %55 = vector.extract_strided_slice %34 {offsets = [3, 0], sizes = [16, 32], strides = [1, 1]} : vector<20x32xf32> to vector<16x32xf32>
    %56 = vector.extract_strided_slice %35 {offsets = [3, 0, 0], sizes = [1, 1, 32], strides = [1, 1, 1]} : vector<5x1x32xf32> to vector<1x1x32xf32>
    %57 = vector.shape_cast %56 : vector<1x1x32xf32> to vector<1x32xf32>
    %58 = vector.broadcast %57 : vector<1x32xf32> to vector<16x32xf32>
    %59 = arith.mulf %55, %58 : vector<16x32xf32>
    %60 = arith.addf %54, %59 : vector<16x32xf32>
    %61 = vector.extract_strided_slice %34 {offsets = [4, 0], sizes = [16, 32], strides = [1, 1]} : vector<20x32xf32> to vector<16x32xf32>
    %62 = vector.extract_strided_slice %35 {offsets = [4, 0, 0], sizes = [1, 1, 32], strides = [1, 1, 1]} : vector<5x1x32xf32> to vector<1x1x32xf32>
    %63 = vector.shape_cast %62 : vector<1x1x32xf32> to vector<1x32xf32>
    %64 = vector.broadcast %63 : vector<1x32xf32> to vector<16x32xf32>
    %65 = arith.mulf %61, %64 : vector<16x32xf32>
    %66 = arith.addf %60, %65 : vector<16x32xf32>
    %c0_17 = arith.constant 0 : index
    %c0_18 = arith.constant 0 : index
    %67 = vector.load %arg5[%c0_17, %c0_18] : memref<1x32xf32, #tpu.memory_space<vmem>>, vector<1x32xf32>
    %68 = vector.broadcast %67 : vector<1x32xf32> to vector<16x32xf32>
    %69 = arith.addf %66, %68 : vector<16x32xf32>
    %70 = arith.negf %69 : vector<16x32xf32>
    %71 = math.exp %70 : vector<16x32xf32>
    %cst_19 = arith.constant 1.000000e+00 : f32
    %72 = vector.broadcast %cst_19 : f32 to vector<16x32xf32>
    %73 = arith.addf %72, %71 : vector<16x32xf32>
    %74 = arith.divf %72, %73 : vector<16x32xf32>
    %75 = arith.mulf %69, %74 : vector<16x32xf32>
    %c0_20 = arith.constant 0 : index
    %c0_21 = arith.constant 0 : index
    %76 = vector.load %arg6[%c0_20, %c0_21] : memref<32x32xf32, #tpu.memory_space<vmem>>, vector<32x32xf32>
    %cst_22 = arith.constant dense<0.000000e+00> : vector<16x32xf32>
    %77 = tpu.matmul %75, %76, %cst_22 {dimension_numbers = #tpu.dot_dimension_numbers<[1], [0], [0], [1], [0, 0, 1, 1], [], []>} : vector<16x32xf32>, vector<32x32xf32>, vector<16x32xf32> -> vector<16x32xf32>
    %c0_23 = arith.constant 0 : index
    %c0_24 = arith.constant 0 : index
    %c0_25 = arith.constant 0 : index
    %78 = vector.load %arg7[%c0_23, %c0_24, %c0_25] : memref<1x16x32xf32, #tpu.memory_space<vmem>>, vector<1x16x32xf32>
    %79 = vector.shape_cast %78 : vector<1x16x32xf32> to vector<16x32xf32>
    %80 = vector.shape_cast %77 : vector<16x32xf32> to vector<1x16x32xf32>
    tpu.vector_store %arg7[%c0_23, %c0_24, %c0_25], %80 {strides = array<i32>} : memref<1x16x32xf32, #tpu.memory_space<vmem>>, vector<1x16x32xf32>,
    return
  }
  func.func @transform_0(%arg0: i32) -> (i32, i32, i32) {
    %c0_i32 = arith.constant 0 : i32
    %c0_i32_0 = arith.constant 0 : i32
    %c0_i32_1 = arith.constant 0 : i32
    return %arg0, %c0_i32, %c0_i32_0 : i32, i32, i32
  }
  func.func @transform_1(%arg0: i32) -> (i32, i32) {
    %c0_i32 = arith.constant 0 : i32
    %c0_i32_0 = arith.constant 0 : i32
    %c0_i32_1 = arith.constant 0 : i32
    return %c0_i32, %c0_i32_0 : i32, i32
  }
  func.func @transform_2(%arg0: i32) -> (i32, i32) {
    %c0_i32 = arith.constant 0 : i32
    %c0_i32_0 = arith.constant 0 : i32
    %c0_i32_1 = arith.constant 0 : i32
    return %c0_i32, %c0_i32_0 : i32, i32
  }
  func.func @transform_3(%arg0: i32) -> (i32, i32, i32) {
    %c0_i32 = arith.constant 0 : i32
    %c0_i32_0 = arith.constant 0 : i32
    %c0_i32_1 = arith.constant 0 : i32
    %c0_i32_2 = arith.constant 0 : i32
    return %c0_i32, %c0_i32_0, %c0_i32_1 : i32, i32, i32
  }
  func.func @transform_4(%arg0: i32) -> (i32, i32) {
    %c0_i32 = arith.constant 0 : i32
    %c0_i32_0 = arith.constant 0 : i32
    %c0_i32_1 = arith.constant 0 : i32
    return %c0_i32, %c0_i32_0 : i32, i32
  }
  func.func @transform_5(%arg0: i32) -> (i32, i32) {
    %c0_i32 = arith.constant 0 : i32
    %c0_i32_0 = arith.constant 0 : i32
    %c0_i32_1 = arith.constant 0 : i32
    return %c0_i32, %c0_i32_0 : i32, i32
  }
  func.func @transform_6(%arg0: i32) -> (i32, i32, i32) {
    %c0_i32 = arith.constant 0 : i32
    %c0_i32_0 = arith.constant 0 : i32
    %c0_i32_1 = arith.constant 0 : i32
    return %arg0, %c0_i32, %c0_i32_0 : i32, i32, i32
  }
}

</mosaic_0001>

<bundles_post_ra>
// kernel: tpu_custom_call.1
= control target key start
LH: loop header
LB: loop body
LE: loop exit
PB: predicated region body
PF: predicated region fallthrough
CT: control target
= control target key end

     0   :  { %11 = vsyncpa [#allocation3], 0  ;;  %s1363_s0 = inlined_call_operand.hbm [shape: f32[2,16,32], index: 0, kind: input, shape index: {}]   ;;  %s1364_s1 = inlined_call_operand.hbm [shape: f32[32,64], index: 1, kind: input, shape index: {}]   ;;  %s1365_s2 = inlined_call_operand.vmem [shape: f32[1,64], index: 2, kind: input, shape index: {}]   ;;  %s1366_s3 = inlined_call_operand.hbm [shape: f32[5,1,32], index: 3, kind: input, shape index: {}]   ;;  %s1367_s4 = inlined_call_operand.vmem [shape: f32[1,32], index: 4, kind: input, shape index: {}]   ;;  %s1368_s5 = inlined_call_operand.hbm [shape: f32[32,32], index: 5, kind: input, shape index: {}]   ;;  %s1369_s6 = inlined_call_operand.hbm [shape: f32[2,16,32], index: 6, kind: output, shape index: {}]  }
   0x1   :  { %13 = vsyncpa [#allocation3 + $0x1], 0 }
   0x2   :  { %14 = vsyncpa [#allocation6], 0 }
   0x3   :  { %15 = vsyncpa [#allocation9], 0 }
   0x4   :  { %16 = vsyncpa [#allocation4], 0 }
   0x5   :  { %18 = vsyncpa [#allocation4 + $0x1], 0  ;;  %s1157_s21 = smov 0   ;;  %s1159_s22 = smov 0  }
   0x6   :  { %s1161_s23 = smov 0   ;;  %s1163_s24 = smov 0  }
   0x7 LB: > { %s1178_s25 = sadd.s32 4294967295, %s1109_s24   ;;  %s763_s26 = sadd.s32 4294967294, %s1109_s24   ;;  %s1109_s24 = sphi %s1163_s24, %s1384_s24   ;;  %s1105_s23 = sphi %s1161_s23, %s1383_s23   ;;  %s1101_s22 = sphi %s1159_s22, %s1382_s22   ;;  %s1097_s21 = sphi %s1157_s21, %s1381_s21  }
   0x8   : > { %p44_p0 = scmp.ne.s32.totalorder %s1101_s22, %s1097_s21  ;;  %p45_p1 = scmp.eq.s32.totalorder %s1178_s25, 0 }
   0x9   : > { %p173_p2 = scmp.eq.s32.totalorder %s1178_s25, 1  ;;  %p179_p3 = scmp.eq.s32.totalorder %s763_s26, 1 }
   0xa   : > { %p1187_p4 = por %p45_p1, %p44_p0  ;;  %p764_p5 = scmp.ge.s32.totalorder %s1109_s24, 1 }
   0xb   : > { %p1192_p6 = por %p179_p3, %p44_p0  ;;  %p186_p7 = scmp.lt.s32.totalorder %s1109_s24, 3 }
   0xc   : > { %s197_s7 = sshll.u32 %s1364_s1, 4  ;;  %s1111_s9 = smov [#allocation5]   ;;  %s198_s7 = int_to_ptr.hbm [resolvable:$true] %s197_s7 }
   0xd   : > { %p1200_p8 = pnand %p764_p5, %p186_p7  ;;  %s199_s10 = sshll.u32 %s1111_s9, 4  ;;  %s200_s10 = int_to_ptr.vmem [resolvable:$true] %s199_s10 }
   0xe   : > { %s214_s14 = sshll.u32 %s1366_s3, 4  ;;  %s1370_s15 = smov 128   ;;  %s215_s14 = int_to_ptr.hbm [resolvable:$true] %s214_s14 }
   0xf   : > { %p817_p9 = pneg %p1200_p8  ;;  %s1371_s16 = smov 8  }
  0x10   : > { %s1114_s17 = smov [#allocation7]   ;;  %s1115_s19 = smov 16  }
  0x11   : > { %p1208_p10 = pnand %p817_p9, %p45_p1  ;;  %s216_s18 = sshll.u32 %s1114_s17, 4  ;;  %s217_s18 = int_to_ptr.vmem [resolvable:$true] %s216_s18 }
  0x12   : > { %s1116_s20 = smov 1   ;;  %s231_s30 = sshll.u32 %s1368_s5, 4  ;;  %s232_s30 = int_to_ptr.hbm [resolvable:$true] %s231_s30 }
  0x13   : > { %820 = dma.hbm_to_vmem [thread:$0]  (!%p1208_p10), %s198_s7, 512, %s200_s10, [#allocation6], %s1370_s15, %s1370_s15, %s1371_s16  }
  0x14   : > { %823 = dma.hbm_to_vmem [thread:$0]  (!%p1208_p10), %s215_s14, 80, %s217_s18, [#allocation6], %s1115_s19, %s1115_s19, %s1116_s20  }
  0x15   : > { %s1117_s7 = smov [#allocation8]   ;;  %s1232_s10 = sadd.s32 1, %s1109_s24  }
  0x16   : > { %s233_s9 = sshll.u32 %s1117_s7, 4  ;;  %s28_s12 = ssub.s32 %s1109_s24, %s1232_s10  ;;  %s234_s9 = int_to_ptr.vmem [resolvable:$true] %s233_s9 }
  0x17   : > { %826 = dma.hbm_to_vmem [thread:$0]  (!%p1208_p10), %s232_s30, 512, %s234_s9, [#allocation9], %s1370_s15, %s1370_s15, %s1371_s16  }
  0x18   : > { %s31_s13 = sadd.s32 1, %s1105_s23  ;;  %p29_p12 = scmp.eq.s32.totalorder %s28_s12, 0 }
  0x19   : > { %p38_p13 = scmp.ne.s32.totalorder %s1105_s23, %s1101_s22  ;;  %p39_p0 = scmp.eq.s32.totalorder %s1109_s24, 0 }
  0x1a   : > { %s1241_s14 = scalar_select %p29_p12, %s1105_s23, %s31_s13  }
  0x1b   : > { %p1245_p3 = por %p173_p2, %p38_p13  ;;  %p838_p5 = scmp.lt.s32.totalorder %s1109_s24, 2 }
  0x1c   : > { %s247_s11 = sand.u32 1, %s1105_s23   ;;  %s791_s18 = sshll.u32 %s1109_s24, 4 }
  0x1d   : > { %p40_p7 = por %p39_p0, %p38_p13  ;;  %s769_s19 = sshll.u32 %s247_s11, 4 }
  0x1e   : > { %s256_s29 = scalar_lea.hbm %s1363_s0, %s791_s18  ;;  %s251_s7 = scalar_lea.vmem [#allocation2], %s769_s19 }
  0x1f   : > { %s257_s30 = sshll.u32 %s256_s29, 4  ;;  %s259_s9 = sshll.u32 %s251_s7, 4  ;;  %s258_s30 = int_to_ptr.hbm [resolvable:$true] %s257_s30  ;;  %s260_s9 = int_to_ptr.vmem [resolvable:$true] %s259_s9 }
  0x20   : > { %p1255_p9 = pnand %p838_p5, %p40_p7  ;;  %s248_s13 = scalar_lea.sflag [#allocation3], %s247_s11 }
  0x21   : > { %s1005_s15 = sshra.s32 %s258_s30, 4  ;;  %s1012_s19 = scalar_lea.hbm %s1363_s0, 32  ;;  %s1006_s15 = int_to_ptr.hbm [resolvable:$true] %s1005_s15 }
  0x22   : > { %s1007_s16 = scalar_lea.hbm %s1006_s15, 16  ;;  %p1009_p10 = pneg %p1255_p9 }
  0x23   : > { %p1008_p2 = scmp.ne.s32.totalorder %s1006_s15, %s1007_s16  ;;  %p1013_p0 = scmp.lt.s32.totalorder %s1006_s15, %s1363_s0 }
  0x24   : > { %p1014_p5 = scmp.lt.s32.totalorder %s1012_s19, %s1007_s16 }
  0x25   : > { %p1010_p12 = pnand %p1009_p10, %p1008_p2 }
  0x26   : > { %p1015_p7 = por %p1014_p5, %p1013_p0 }
  0x27   : > { %p1011_p13 = pneg %p1010_p12 }
  0x29   : > { %p1016_p11 = pnand %p1015_p7, %p1011_p13 }
  0x2b   : > { %1019 = shalt.err (!%p1016_p11)
}
  0x2c   : > { %s1378_s11 = smov 8   ;;  %s1379_s7 = smov 128  }
  0x2d   : > { %830 = dma.hbm_to_vmem [thread:$0]  (!%p1255_p9), %s258_s30, 256, %s260_s9, %s248_s13, %s1379_s7, %s1379_s7, %s1378_s11  }
  0x2e   : > { %271 = sbr.rel (%p1200_p8) target bundleno = 651 (0x28b), region = 44  ;;  %s1275_s18 = sand.u32 (!%p1200_p8), 1, %s1101_s22  }
  0x2f   : > { %s773_s15 = sshll.u32 (!%p1200_p8), %s1275_s18, 4  ;;  %s274_s16 = scalar_lea.sflag (!%p1200_p8), [#allocation3], %s1275_s18 }
  0x30   : > { %s277_s20 = scalar_lea.vmem (!%p1200_p8), [#allocation2], %s773_s15 }
  0x33   : > { %1080 = dma.done.wait (%p1187_p4), %s274_s16, 256  }
  0x34   : > { %1082 = vsyncadd (%p1187_p4), %s274_s16, 4294967040 }
  0x35   : > { %1084 = dma.done.wait (%p45_p1), [#allocation6], 592  }
  0x36   : > { %1086 = vsyncadd (%p45_p1), [#allocation6], 4294966704 }
  0x37   : > { %1088 = dma.done.wait (%p45_p1), [#allocation9], 512  }
  0x38   : > { %1090 = vsyncadd (%p45_p1), [#allocation9], 4294966784  ;;  %vm324_vm0 = vcmask 261120   ;;  %v1293_v0 = vld [vmem:[%s277_s20 + $0x8] sm:$0xff]  ;;  %v1295_v1 = vld [vmem:[%s277_s20] sm:$0xff]  ;;  %v1118_v8 = vmov 32.0  }
  0x39   : > { %v328_v2 = vsel %vm324_vm0, %v1293_v0, 0.0  ;;  %v325_v3 = vsel %vm324_vm0, %v1295_v1, 0.0  ;;  %v341_v4 = vmul.f32 %v1293_v0, %v1293_v0  ;;  %v340_v5 = vmul.f32 %v1295_v1, %v1295_v1  ;;  %v383_v13 = vld [vmem:[#allocation5 + $0x18] sm:$0xff]  ;;  %v382_v14 = vld [vmem:[#allocation5 + $0x10] sm:$0xff]  ;;  %v381_v16 = vld [vmem:[#allocation5 + $0x8] sm:$0xff]  ;;  %s1119_s30 = smov 96  }
  0x3a   : > { %329 = vadd.xlane.f32.xlu0 %v328_v2  ;;  %326 = vadd.xlane.f32.xlu1 %v325_v3  ;;  %893 = vrcp.f32 %v1118_v8  ;;  %v380_v19 = vld [vmem:[#allocation5] sm:$0xff]  ;;  %s792_s13 = sshll.u32 %s1178_s25, 4  ;;  %s321_s11 = scalar_lea.vmem [#allocation10], %s773_s15 }
  0x3b   : > { %v345_v6 = vsel %vm324_vm0, %v341_v4, 0.0  ;;  %v342_v7 = vsel %vm324_vm0, %v340_v5, 0.0  ;;  %406 = vmatpush.msra.mxu0 %v383_v13  ;;  %793 = vmatpush.msra.mxu2 %v383_v13  ;;  %v886_v51 = vld [vmem:[%s1365_s2] ss:$0 sm:$0xff]  ;;  %s657_s29 = scalar_lea.hbm %s1369_s6, %s792_s13  ;;  %s658_s7 = sshll.u32 %s321_s11, 4  ;;  %s659_s7 = int_to_ptr.vmem [resolvable:$true] %s658_s7 }
  0x3c   : > { %s660_s16 = sshll.u32 %s657_s29, 4  ;;  %s646_s20 = scalar_lea.sflag [#allocation4], %s1275_s18  ;;  %s661_s16 = int_to_ptr.hbm [resolvable:$true] %s660_s16 }
  0x3d   : > { %407 = vmatpush.msra.mxu0 %v382_v14  ;;  %794 = vmatpush.msra.mxu2 %v382_v14  ;;  %s1049_s27 = sshra.s32 %s661_s16, 4  ;;  %s1055_s15 = scalar_lea.hbm %s1369_s6, 32  ;;  %s1050_s27 = int_to_ptr.hbm [resolvable:$true] %s1049_s27 }
  0x3e   : > { %s1051_s25 = scalar_lea.hbm %s1050_s27, 16  ;;  %p1056_p11 = scmp.lt.s32.totalorder %s1050_s27, %s1369_s6 }
  0x3f   : > { %408 = vmatpush.msra.mxu0 %v381_v16  ;;  %795 = vmatpush.msra.mxu2 %v381_v16  ;;  %p1052_p1 = scmp.ne.s32.totalorder %s1050_s27, %s1051_s25  ;;  %p1057_p9 = scmp.lt.s32.totalorder %s1055_s15, %s1051_s25 }
  0x40   : > { %v894_v9 = vpop.eup %893 }
  0x41   : > { %v332_v10 = vmul.f32 32.0, %v894_v9  ;;  %vm336_vm1 = vweird.f32 %v894_v9  ;;  %409 = vmatpush.msra.mxu0 %v380_v19  ;;  %796 = vmatpush.msra.mxu2 %v380_v19  ;;  %v612_v19 = vld [vmem:[#allocation8 + $0x10] sm:$0xff]  ;;  %p1053_p4 = pnand %p1052_p1, %p1245_p3  ;;  %p1058_p2 = por %p1057_p9, %p1056_p11 }
  0x42   : > { %346 = vadd.xlane.f32.xlu0 %v345_v6  ;;  %343 = vadd.xlane.f32.xlu1 %v342_v7 }
  0x43   : > { %v333_v11 = vsub.f32 1.0, %v332_v10  ;;  %p1054_p8 = pneg %p1053_p4 }
  0x45   : > { %v334_v12 = vmul.f32 %v894_v9, %v333_v11  ;;  %p1059_p10 = pnand %p1058_p2, %p1054_p8 }
  0x47   : > { %v335_v15 = vadd.f32 %v894_v9, %v334_v12 }
  0x49   : > { %v337_v20 = vsel %vm336_vm1, %v894_v9, %v335_v15  ;;  %vm467_vm1 = vcmask 1041408  }
  0xad   : > { %v330_v17 = vpop.xlane.xlu0 %329  ;;  %v327_v18 = vpop.xlane.xlu1 %326 }
  0xae   : > { %v339_v21 = vmul.f32 %v337_v20, %v330_v17  ;;  %v338_v22 = vmul.f32 %v337_v20, %v327_v18  ;;  %v613_v18 = vld [vmem:[#allocation8 + $0x18] sm:$0xff] }
  0xaf   : > { %632 = vmatpush.msra.mxu1 %v613_v18  ;;  %797 = vmatpush.msra.mxu3 %v613_v18 }
  0xb0   : > { %v351_v25 = vmul.f32 %v339_v21, %v339_v21  ;;  %v350_v26 = vmul.f32 %v338_v22, %v338_v22  ;;  %v355_v44 = vsub.f32 %v1293_v0, %v339_v21  ;;  %v354_v46 = vsub.f32 %v1295_v1, %v338_v22  ;;  %v610_v21 = vld [vmem:[#allocation8] sm:$0xff] }
  0xb1   : > { %633 = vmatpush.msra.mxu1 %v612_v19  ;;  %798 = vmatpush.msra.mxu3 %v612_v19 }
  0xb5   : > { %v347_v23 = vpop.xlane.xlu0 %346  ;;  %v344_v24 = vpop.xlane.xlu1 %343 }
  0xb6   : > { %v349_v27 = vmul.f32 %v347_v23, %v337_v20  ;;  %v348_v28 = vmul.f32 %v344_v24, %v337_v20  ;;  %v611_v20 = vld [vmem:[#allocation8 + $0x8] sm:$0xff] }
  0xb7   : > { %634 = vmatpush.msra.mxu1 %v611_v20  ;;  %799 = vmatpush.msra.mxu3 %v611_v20 }
  0xb8   : > { %v353_v29 = vsub.f32 %v349_v27, %v351_v25  ;;  %v352_v30 = vsub.f32 %v348_v28, %v350_v26  ;;  %v888_v25 = vld [vmem:[#allocation7 + $0x1] ss:$0 sm:$0xff]  ;;  %v887_v27 = vld [vmem:[#allocation7] ss:$0 sm:$0xff] }
  0xb9   : > { %635 = vmatpush.msra.mxu1 %v610_v21  ;;  %800 = vmatpush.msra.mxu3 %v610_v21 }
  0xba   : > { %v357_v31 = vadd.f32 1e-05, %v353_v29  ;;  %v356_v32 = vadd.f32 1e-05, %v352_v30  ;;  %v889_v29 = vld [vmem:[#allocation7 + $0x2] ss:$0 sm:$0xff] }
  0xbb   : > { %v890_v30 = vld [vmem:[#allocation7 + $0x3] ss:$0 sm:$0xff] }
  0xbc   : > { %895 = vrsqrt.f32 %v357_v31  ;;  %vm374_vm4 = vweird.f32 %v357_v31  ;;  %vm364_vm5 = vweird.f32 %v356_v32 }
  0xbd   : > { %897 = vrsqrt.f32 %v356_v32 }
  0xc2   : > { %v896_v33 = vpop.eup %895 }
  0xc3   : > { %v898_v34 = vpop.eup %897  ;;  %v369_v35 = vmul.f32 %v896_v33, %v357_v31  ;;  %vm375_vm2 = vweird.f32 %v896_v33 }
  0xc4   : > { %v359_v36 = vmul.f32 %v898_v34, %v356_v32  ;;  %vm365_vm3 = vweird.f32 %v898_v34  ;;  %vm376_vm6 = vmor %vm374_vm4, %vm375_vm2  ;;  %vm497_vm2 = vcmask 1046528   ;;  %vm535_vm4 = vcmask 1044480  }
  0xc5   : > { %v370_v37 = vmul.f32 %v896_v33, %v369_v35  ;;  %vm366_vm7 = vmor %vm364_vm5, %vm365_vm3  ;;  %vm516_vm3 = vcmask 1045504   ;;  %v891_v35 = vld [vmem:[#allocation7 + $0x4] ss:$0 sm:$0xff]  ;;  %vm554_vm5 = vcmask 1043456  }
  0xc6   : > { %v360_v38 = vmul.f32 %v898_v34, %v359_v36 }
  0xc7   : > { %v371_v39 = vmul.f32 0.5, %v370_v37 }
  0xc8   : > { %v361_v40 = vmul.f32 0.5, %v360_v38 }
  0xc9   : > { %v372_v41 = vsub.f32 1.5, %v371_v39 }
  0xca   : > { %v362_v42 = vsub.f32 1.5, %v361_v40 }
  0xcb   : > { %v373_v43 = vmul.f32 %v896_v33, %v372_v41 }
  0xcc   : > { %v363_v45 = vmul.f32 %v898_v34, %v362_v42 }
  0xcd   : > { %v377_v47 = vsel %vm376_vm6, %v896_v33, %v373_v43 }
  0xce   : > { %v367_v48 = vsel %vm366_vm7, %v898_v34, %v363_v45  ;;  %v379_v49 = vmul.f32 %v377_v47, %v355_v44 }
  0xcf   : > { %v378_v50 = vmul.f32 %v367_v48, %v354_v46 }
  0xd0   : > { %779 = vmatmul.msk.f32.vlgmr.msra.gmra.mxu2 %vm324_vm0, %v379_v49 }
  0xd1   : > { %778 = vmatmul.msk.f32.vlgmr.msra.gmra.mxu0 %vm324_vm0, %v378_v50 }
 0x14e   : > { %v411_v52 = vpop.f32.mrf.mxu0 }
 0x14f   : > { %v412_v53 = vadd.f32 %v886_v51, %v411_v52 }
 0x151   : > { %v780_v54 = vmul.f32 -1.442695, %v412_v53 }
 0x153   : > { %899 = vpow2.f32 %v780_v54  ;;  %v414_v55 = vpop.f32.mrf.mxu2 }
 0x154   : > { %v415_v56 = vadd.f32 %v886_v51, %v414_v55 }
 0x156   : > { %v781_v57 = vmul.f32 -1.442695, %v415_v56 }
 0x158   : > { %901 = vpow2.f32 %v781_v57 }
 0x159   : > { %v900_v58 = vpop.eup %899 }
 0x15a   : > { %v423_v59 = vadd.f32 1.0, %v900_v58 }
 0x15c   : > { %903 = vrcp.f32 %v423_v59  ;;  %v436_v1 = vand.u32 2147483648, %v423_v59  ;;  %v434_v4 = vand.u32 2147483647, %v423_v59  ;;  %vm430_vm9 = vweird.f32 %v423_v59 }
 0x15e   : > { %v902_v60 = vpop.eup %901  ;;  %v437_v7 = vor.u32 1.1754944e-38, %v436_v1  ;;  %vm435_vm11 = vcmp.eq.f32.partialorder %v434_v4, 8.507059e+37 }
 0x15f   : > { %v424_v61 = vadd.f32 1.0, %v902_v60 }
 0x161   : > { %905 = vrcp.f32 %v424_v61  ;;  %v451_v13 = vand.u32 2147483648, %v424_v61  ;;  %vm445_vm13 = vweird.f32 %v424_v61  ;;  %v449_v14 = vand.u32 2147483647, %v424_v61 }
 0x162   : > { %v904_v62 = vpop.eup %903 }
 0x163   : > { %v426_v63 = vmul.f32 %v904_v62, %v423_v59  ;;  %vm431_vm8 = vweird.f32 %v904_v62  ;;  %v452_v16 = vor.u32 1.1754944e-38, %v451_v13  ;;  %vm450_vm15 = vcmp.eq.f32.partialorder %v449_v14, 8.507059e+37 }
 0x164   : > { %vm432_vm10 = vmor %vm430_vm9, %vm431_vm8 }
 0x165   : > { %v427_v0 = vsub.f32 1.0, %v426_v63 }
 0x167   : > { %v906_v2 = vpop.eup %905  ;;  %v428_v3 = vmul.f32 %v904_v62, %v427_v0 }
 0x168   : > { %v441_v5 = vmul.f32 %v906_v2, %v424_v61  ;;  %vm446_vm12 = vweird.f32 %v906_v2 }
 0x169   : > { %v429_v6 = vadd.f32 %v904_v62, %v428_v3  ;;  %vm447_vm14 = vmor %vm445_vm13, %vm446_vm12 }
 0x16a   : > { %v442_v8 = vsub.f32 1.0, %v441_v5 }
 0x16b   : > { %v433_v9 = vsel %vm432_vm10, %v904_v62, %v429_v6 }
 0x16c   : > { %v438_v10 = vsel %vm435_vm11, %v437_v7, %v433_v9  ;;  %v443_v11 = vmul.f32 %v906_v2, %v442_v8  ;;  %v892_v9 = vld [vmem:[%s1367_s4] ss:$0 sm:$0xff] }
 0x16d   : > { %457 = vrot.lane.b32.xlu2 %v438_v10, %s1119_s30 }
 0x16e   : > { %v444_v12 = vadd.f32 %v906_v2, %v443_v11 }
 0x170   : > { %v448_v15 = vsel %vm447_vm14, %v906_v2, %v444_v12 }
 0x171   : > { %v453_v17 = vsel %vm450_vm15, %v452_v16, %v448_v15 }
 0x175   : > { %459 = vrot.lane.b32.xlu2 %v453_v17, %s1119_s30 }
 0x1c7   : > { %v458_v22 = vpop.permute.xlu2 %457 }
 0x1c8   : > { %v463_v23 = vmul.f32 %v458_v22, %v412_v53 }
 0x1ca   : > { %v468_v24 = vrot.slane %v463_v23, 6 }
 0x1cc   : > { %v474_v26 = vsel %vm467_vm1, 0.0, %v468_v24 }
 0x1cd   : > { %v491_v32 = vmul.f32 %v888_v25, %v474_v26  ;;  %v484_v34 = vmul.f32 %v887_v27, %v474_v26  ;;  %v510_v36 = vmul.f32 %v889_v29, %v474_v26  ;;  %v529_v37 = vmul.f32 %v890_v30, %v474_v26 }
 0x1ce   : > { %v548_v53 = vmul.f32 %v891_v35, %v474_v26 }
 0x1cf   : > { %v460_v28 = vpop.permute.xlu2 %459  ;;  %v498_v40 = vrot.slane %v491_v32, 1  ;;  %v517_v52 = vrot.slane %v510_v36, 2  ;;  %v536_v60 = vrot.slane %v529_v37, 3 }
 0x1d0   : > { %v464_v31 = vmul.f32 %v460_v28, %v415_v56  ;;  %v555_v5 = vrot.slane %v548_v53, 4 }
 0x1d2   : > { %v469_v33 = vrot.slane %v464_v31, 6 }
 0x1d4   : > { %v470_v38 = vsel %vm467_vm1, %v468_v24, %v469_v33  ;;  %v475_v39 = vsel %vm467_vm1, %v469_v33, 0.0 }
 0x1d5   : > { %v492_v41 = vmul.f32 %v888_v25, %v470_v38  ;;  %v493_v42 = vmul.f32 %v888_v25, %v475_v39  ;;  %v511_v43 = vmul.f32 %v889_v29, %v470_v38  ;;  %v512_v44 = vmul.f32 %v889_v29, %v475_v39 }
 0x1d6   : > { %v530_v45 = vmul.f32 %v890_v30, %v470_v38  ;;  %v531_v46 = vmul.f32 %v890_v30, %v475_v39  ;;  %v549_v47 = vmul.f32 %v891_v35, %v470_v38  ;;  %v550_v51 = vmul.f32 %v891_v35, %v475_v39 }
 0x1d7   : > { %v499_v48 = vrot.slane %v492_v41, 1  ;;  %v501_v49 = vrot.slane %v493_v42, 1  ;;  %v518_v50 = vrot.slane %v511_v43, 2  ;;  %v485_v54 = vmul.f32 %v887_v27, %v470_v38 }
 0x1d8   : > { %v520_v55 = vrot.slane %v512_v44, 2  ;;  %v537_v57 = vrot.slane %v530_v45, 3  ;;  %v539_v58 = vrot.slane %v531_v46, 3  ;;  %v556_v0 = vrot.slane %v549_v47, 4 }
 0x1d9   : > { %v502_v56 = vsel %vm497_vm2, %v499_v48, %v501_v49  ;;  %v500_v59 = vsel %vm497_vm2, %v498_v40, %v499_v48  ;;  %v558_v1 = vrot.slane %v550_v51, 4  ;;  %v519_v2 = vsel %vm516_vm3, %v517_v52, %v518_v50 }
 0x1da   : > { %v506_v61 = vadd.f32 %v502_v56, %v485_v54  ;;  %v505_v62 = vadd.f32 %v500_v59, %v484_v34  ;;  %v521_v63 = vsel %vm516_vm3, %v518_v50, %v520_v55  ;;  %v538_v6 = vsel %vm535_vm4, %v536_v60, %v537_v57 }
 0x1db   : > { %v540_v7 = vsel %vm535_vm4, %v537_v57, %v539_v58  ;;  %v557_v11 = vsel %vm554_vm5, %v555_v5, %v556_v0  ;;  %v559_v12 = vsel %vm554_vm5, %v556_v0, %v558_v1 }
 0x1dc   : > { %v524_v3 = vadd.f32 %v519_v2, %v505_v62  ;;  %v525_v4 = vadd.f32 %v521_v63, %v506_v61 }
 0x1de   : > { %v543_v8 = vadd.f32 %v538_v6, %v524_v3  ;;  %v544_v10 = vadd.f32 %v540_v7, %v525_v4 }
 0x1e0   : > { %v562_v13 = vadd.f32 %v557_v11, %v543_v8  ;;  %v563_v14 = vadd.f32 %v559_v12, %v544_v10 }
 0x1e2   : > { %v568_v15 = vadd.f32 %v892_v9, %v562_v13  ;;  %v569_v16 = vadd.f32 %v892_v9, %v563_v14 }
 0x1e4   : > { %v782_v17 = vmul.f32 -1.442695, %v568_v15  ;;  %v783_v18 = vmul.f32 -1.442695, %v569_v16 }
 0x1e6   : > { %907 = vpow2.f32 %v782_v17 }
 0x1e7   : > { %909 = vpow2.f32 %v783_v18 }
 0x1ec   : > { %v908_v19 = vpop.eup %907 }
 0x1ed   : > { %v910_v20 = vpop.eup %909  ;;  %v576_v21 = vadd.f32 1.0, %v908_v19 }
 0x1ee   : > { %v577_v22 = vadd.f32 1.0, %v910_v20 }
 0x1ef   : > { %911 = vrcp.f32 %v576_v21  ;;  %v589_v28 = vand.u32 2147483648, %v576_v21  ;;  %v587_v31 = vand.u32 2147483647, %v576_v21  ;;  %vm583_vm8 = vweird.f32 %v576_v21 }
 0x1f0   : > { %913 = vrcp.f32 %v577_v22  ;;  %v604_v32 = vand.u32 2147483648, %v577_v22  ;;  %v602_v34 = vand.u32 2147483647, %v577_v22  ;;  %vm598_vm10 = vweird.f32 %v577_v22 }
 0x1f1   : > { %v590_v36 = vor.u32 1.1754944e-38, %v589_v28  ;;  %vm588_vm11 = vcmp.eq.f32.partialorder %v587_v31, 8.507059e+37 }
 0x1f2   : > { %v605_v39 = vor.u32 1.1754944e-38, %v604_v32  ;;  %vm603_vm13 = vcmp.eq.f32.partialorder %v602_v34, 8.507059e+37 }
 0x1f5   : > { %v912_v23 = vpop.eup %911 }
 0x1f6   : > { %v914_v24 = vpop.eup %913  ;;  %v579_v25 = vmul.f32 %v912_v23, %v576_v21  ;;  %vm584_vm6 = vweird.f32 %v912_v23 }
 0x1f7   : > { %v594_v26 = vmul.f32 %v914_v24, %v577_v22  ;;  %vm599_vm7 = vweird.f32 %v914_v24  ;;  %vm585_vm9 = vmor %vm583_vm8, %vm584_vm6 }
 0x1f8   : > { %v580_v27 = vsub.f32 1.0, %v579_v25  ;;  %vm600_vm12 = vmor %vm598_vm10, %vm599_vm7 }
 0x1f9   : > { %v595_v29 = vsub.f32 1.0, %v594_v26 }
 0x1fa   : > { %v581_v30 = vmul.f32 %v912_v23, %v580_v27 }
 0x1fb   : > { %v596_v33 = vmul.f32 %v914_v24, %v595_v29 }
 0x1fc   : > { %v582_v35 = vadd.f32 %v912_v23, %v581_v30 }
 0x1fd   : > { %v597_v37 = vadd.f32 %v914_v24, %v596_v33 }
 0x1fe   : > { %v586_v38 = vsel %vm585_vm9, %v912_v23, %v582_v35 }
 0x1ff   : > { %v591_v40 = vsel %vm588_vm11, %v590_v36, %v586_v38  ;;  %v601_v41 = vsel %vm600_vm12, %v914_v24, %v597_v37 }
 0x200   : > { %v608_v42 = vmul.f32 %v591_v40, %v568_v15  ;;  %v606_v43 = vsel %vm603_vm13, %v605_v39, %v601_v41 }
 0x201   : > { %v609_v44 = vmul.f32 %v606_v43, %v569_v16 }
 0x202   : > { %784 = vmatmul.msk.f32.vlgmr.msra.gmra.mxu1 %vm324_vm0, %v608_v42 }
 0x203   : > { %785 = vmatmul.msk.f32.vlgmr.msra.gmra.mxu3 %vm324_vm0, %v609_v44 }
 0x27f   : > { %v637_v45 = vpop.f32.mrf.mxu1 }
 0x280   : > { %643 = vst.msk [vmem:[%s321_s11] sm:$0xff] %vm324_vm0, %v637_v45 }
 0x286   : > { %v640_v46 = vpop.f32.mrf.mxu3 }
 0x287   : > { %644 = vst.msk [vmem:[%s321_s11 + $0x8] sm:$0xff] %vm324_vm0, %v640_v46 }
 0x288   : > { %1062 = shalt.err (!%p1059_p10)
}
 0x289   : > { %s1120_s18 = smov 128   ;;  %s1121_s13 = smov 8  }
 0x28a   : > { %815 = dma.vmem_to_hbm [thread:$0]  (%p1245_p3), %s659_s7, 256, %s661_s16, %s646_s20, %s1120_s18, %s1120_s18, %s1121_s13  }
 0x28b PF: > { %s675_s19 = sand.u32 1, %s1097_s21   ;;  %p1380_p12 = scmp.ge.s32.totalorder %s1109_s24, 2 }
 0x28c   : > { %s676_s26 = scalar_lea.sflag [#allocation4], %s675_s19 }
 0x28d   : > { %p832_p13 = pnand %p1380_p12, %p1192_p6 }
 0x28f   : > { %p833_p0 = pneg %p832_p13 }
 0x291   : > { %1092 = dma.done.wait (%p833_p0), %s676_s26, 256  }
 0x292   : > { %1094 = vsyncadd (%p833_p0), %s676_s26, 4294967040  ;;  %p21_p5 = scmp.ge.s32.totalorder %s1232_s10, 4   ;;  %s1381_s21 = smov %s1101_s22 }
 0x293   : > { %s1382_s22 = smov %s1105_s23  ;;  %s1383_s23 = smov %s1241_s14 }
 0x294   : > { %s1384_s24 = smov %s1232_s10  ;;  %23 = sbr.rel (!%p21_p5) target bundleno = 7 (0x7), region = 101 }
 0x299   :  { %682 = vsyncpa [#allocation3], 1 }
 0x29a   :  { %684 = vsyncpa [#allocation3 + $0x1], 1 }
 0x29b   :  { %685 = vsyncpa [#allocation6], 1 }
 0x29c   :  { %686 = vsyncpa [#allocation9], 1 }
 0x29d   :  { %687 = vsyncpa [#allocation4], 1 }
 0x29e   :  { %689 = vsyncpa [#allocation4 + $0x1], 1 }

</bundles_post_ra>
